<compile_context>
chip_gen: v5e
topology: v5e:2x2
jax: 0.10.0
libtpu: 0.0.40
codegen_flags: <defaults>
</compile_context>

<pallas_src>
import functools

import jax
import jax.numpy as jnp
import numpy as np
from jax.experimental import pallas as pl
from jax.experimental.pallas import tpu as pltpu

LN_EPS = 1e-5


def _round_up(x: int, m: int) -> int:
    return (x + m - 1) // m * m


def _vmem_capacity_bytes() -> int:
    """Per-TC VMEM capacity (128 MiB on v5e/v6e, 64 MiB on v7x); safe fallback 64 MiB."""
    try:
        cap = int(pltpu.get_tpu_info().vmem_capacity_bytes)
        if cap > 0:
            return cap
    except Exception:
        pass
    return 64 * 1024 * 1024


def concat_aggregator_kernel(
    x_ref,      # (TB, total_dim)   concatenated features for this batch tile
    g_ref,      # (1, total_dim)    LayerNorm gamma
    b_ref,      # (1, total_dim)    LayerNorm beta
    w_ref,      # (total_dim, TN)   Linear weight tile (bf16, pre-cast in wrapper)
    bias_ref,   # (1, TN)           Linear bias tile (f32, zero-padded)
    out_ref,    # (TB, TN)
    y_ref,      # scratch (TB, total_dim) bf16 — normalized tile, reused across j
    *,
    total_dim: int,
):
    j = pl.program_id(1)

    # Compute LayerNorm once per batch tile (j == 0); reuse for all output tiles.
    @pl.when(j == 0)
    def _():
        x = x_ref[...].astype(jnp.float32)                      # (TB, total_dim)
        inv_n = 1.0 / float(total_dim)
        # One-pass statistics: sum and sum-of-squares in a single read of x.
        s1 = jnp.sum(x, axis=-1, keepdims=True)                 # (TB, 1)
        s2 = jnp.sum(x * x, axis=-1, keepdims=True)             # (TB, 1)
        mu = s1 * inv_n
        var = jnp.maximum(s2 * inv_n - mu * mu, 0.0)            # biased var (torch LN)
        inv = jax.lax.rsqrt(var + LN_EPS)
        y = (x - mu) * inv * g_ref[...] + b_ref[...]            # f32 LN affine
        y_ref[...] = y.astype(jnp.bfloat16)                     # bf16 MXU operand

    # Linear tile: single K = total_dim matmul (bf16 x bf16 -> f32 accumulate).
    acc = jnp.dot(y_ref[...], w_ref[...], preferred_element_type=jnp.float32)
    out = acc + bias_ref[...]
    # ReLU; Dropout(p) in eval mode == identity.
    out_ref[...] = jnp.maximum(out, 0.0).astype(out_ref.dtype)


def concat_aggregator_forward(features, gamma, beta, weight, bias):
    """features: list of (B, D) arrays. gamma/beta: (F*D,). weight: (F*D, O). bias: (O,)."""
    f = len(features)
    B, D = features[0].shape
    total_dim = f * D
    O = weight.shape[1]
    x_dtype = features[0].dtype
    x_sz = jnp.dtype(x_dtype).itemsize
    out_sz = x_sz

    # One-time lane-dense concat (torch semantics) -> single big-K matmul in kernel.
    x = jnp.concatenate(features, axis=-1)                       # (B, total_dim), input dtype

    # ---- tile sizes --------------------------------------------------------
    O_128 = max(128, _round_up(O, 128))
    TN = min(O_128, 512)                                         # output tile, mult of 128
    TB = min(256, _round_up(B, 8))                               # batch tile, mult of 8

    vmem_cap = _vmem_capacity_bytes()
    budget = int(0.85 * vmem_cap)

    def blocks_bytes(tb, tn):
        return (2 * tb * total_dim * x_sz          # x (double-buffered)
                + 2 * total_dim * tn * 2           # weight bf16 (double-buffered)
                + 2 * 2 * total_dim * 4            # gamma + beta (f32)
                + 2 * tn * 4                       # bias
                + 2 * tb * tn * out_sz             # out (double-buffered)
                + tb * total_dim * 2)              # y scratch (bf16)

    while blocks_bytes(TB, TN) > budget and TB > 8:
        TB = max(8, TB // 2)
    while blocks_bytes(TB, TN) > budget and TN > 128:
        TN //= 2
    O_pad = _round_up(O_128, TN)                                 # O_pad % TN == 0

    B_pad = _round_up(B, TB)
    if B_pad != B:
        x = jnp.pad(x, ((0, B_pad - B), (0, 0)))

    g2 = gamma.reshape(1, total_dim).astype(jnp.float32)
    b2 = beta.reshape(1, total_dim).astype(jnp.float32)
    w2 = weight.astype(jnp.bfloat16)                             # pre-cast once (MXU dtype)
    bias2 = bias.reshape(1, O).astype(jnp.float32)
    if O_pad != O:
        w2 = jnp.pad(w2, ((0, 0), (0, O_pad - O)))
        bias2 = jnp.pad(bias2, ((0, 0), (0, O_pad - O)))

    grid = (B_pad // TB, O_pad // TN)

    vmem_limit = int(min(max(blocks_bytes(TB, TN) + (2 << 20), 16 * 1024 * 1024), vmem_cap))

    cost = pl.CostEstimate(
        flops=int(2 * B_pad * total_dim * O_pad + 7 * B_pad * total_dim),
        transcendentals=int(B_pad),                              # one rsqrt per row
        bytes_accessed=int(x.size * x_sz + w2.size * 2 + g2.size * 4 + b2.size * 4
                           + bias2.size * 4 + B_pad * O_pad * out_sz),
    )

    out = pl.pallas_call(
        functools.partial(concat_aggregator_kernel, total_dim=total_dim),
        out_shape=jax.ShapeDtypeStruct((B_pad, O_pad), x_dtype),
        grid=grid,
        in_specs=[
            pl.BlockSpec((TB, total_dim), lambda i, j: (i, 0)),      # x: batch-tiled
            pl.BlockSpec((1, total_dim), lambda i, j: (0, 0)),       # gamma (tiny, resident)
            pl.BlockSpec((1, total_dim), lambda i, j: (0, 0)),       # beta
            pl.BlockSpec((total_dim, TN), lambda i, j: (0, j)),      # weight: N-tiled (bf16)
            pl.BlockSpec((1, TN), lambda i, j: (0, j)),              # bias: N-tiled
        ],
        out_specs=pl.BlockSpec((TB, TN), lambda i, j: (i, j)),
        scratch_shapes=[pltpu.VMEM((TB, total_dim), jnp.bfloat16)],  # normalized tile cache
        compiler_params=pltpu.CompilerParams(
            dimension_semantics=("parallel", "arbitrary"),
            vmem_limit_bytes=vmem_limit,
        ),
        cost_estimate=cost,
    )(x, g2, b2, w2, bias2)

    return out[:B, :O]


def reference_forward(features, gamma, beta, weight, bias):
    """Pure-JAX f32 reference of the torch forward (eval mode)."""
    x = jnp.concatenate(features, axis=-1).astype(jnp.float32)   # (B, total_dim)
    mu = jnp.mean(x, axis=-1, keepdims=True)
    var = jnp.mean((x - mu) ** 2, axis=-1, keepdims=True)        # biased (torch)
    y = (x - mu) * jax.lax.rsqrt(var + LN_EPS) * gamma + beta
    out = y @ weight + bias
    return jnp.maximum(out, 0.0)                                 # ReLU; Dropout eval = id


def init_params(key, input_dim, output_dim, n_features):
    total = input_dim * n_features
    k1, k2, k3, k4 = jax.random.split(key, 4)
    gamma = 1.0 + 0.1 * jax.random.normal(k1, (total,), jnp.float32)
    beta = 0.1 * jax.random.normal(k2, (total,), jnp.float32)
    weight = 0.05 * jax.random.normal(k3, (total, output_dim), jnp.float32)  # (in, out)
    bias = 0.05 * jax.random.normal(k4, (output_dim,), jnp.float32)
    return gamma, beta, weight, bias


if __name__ == "__main__":
    # Small shapes consistent with the module: list of (batch, input_dim) features.
    batch, input_dim, output_dim, n_features = 2, 32, 8, 3

    key = jax.random.PRNGKey(0)
    k_feat, k_par = jax.random.split(key)
    feat_keys = jax.random.split(k_feat, n_features)
    features = [jax.random.normal(k, (batch, input_dim), jnp.float32) for k in feat_keys]
    gamma, beta, weight, bias = init_params(k_par, input_dim, output_dim, n_features)

    out = concat_aggregator_forward(features, gamma, beta, weight, bias)
    out = jax.block_until_ready(out)

    ref = reference_forward(features, gamma, beta, weight, bias)
    # bf16 MXU operands with f32 accumulation -> compare against the f32 reference
    # at a bf16-appropriate tolerance.
    np.testing.assert_allclose(np.asarray(out), np.asarray(ref), rtol=2e-2, atol=2e-2)

    print("KERNEL_OK")
</pallas_src>

<mosaic_0001>
module attributes {stable_mosaic.version = 11 : i64} {
  func.func @concat_aggregator_kernel(%arg0: i32, %arg1: i32, %arg2: memref<8x96xf32, #tpu.memory_space<vmem>>, %arg3: memref<1x96xf32, #tpu.memory_space<vmem>>, %arg4: memref<1x96xf32, #tpu.memory_space<vmem>>, %arg5: memref<96x128xbf16, #tpu.memory_space<vmem>>, %arg6: memref<1x128xf32, #tpu.memory_space<vmem>>, %arg7: memref<8x128xf32, #tpu.memory_space<vmem>>, %arg8: memref<8x96xbf16, #tpu.memory_space<vmem>>) attributes {dimension_semantics = [#tpu.dimension_semantics<parallel>, #tpu.dimension_semantics<arbitrary>], iteration_bounds = array<i64: 1, 1>, scalar_prefetch = 0 : i64, scratch_operands = 1 : i64, tpu.core_type = #tpu.core_type<tc>, window_params = [{transform_indices = @transform_0, window_bounds = array<i64: 8, 96>}, {pipeline_mode = #tpu.pipeline_mode<synchronous>, transform_indices = @transform_1, window_bounds = array<i64: 1, 96>}, {pipeline_mode = #tpu.pipeline_mode<synchronous>, transform_indices = @transform_2, window_bounds = array<i64: 1, 96>}, {transform_indices = @transform_3, window_bounds = array<i64: 96, 128>}, {transform_indices = @transform_4, window_bounds = array<i64: 1, 128>}, {transform_indices = @transform_5, window_bounds = array<i64: 8, 128>}]} {
    %c0_i32 = arith.constant 0 : i32
    %0 = arith.cmpi eq, %arg1, %c0_i32 : i32
    %1 = arith.extui %0 : i1 to i32
    %c0_i32_0 = arith.constant 0 : i32
    %2 = arith.cmpi ne, %1, %c0_i32_0 : i32
    scf.if %2 {
      %c0_9 = arith.constant 0 : index
      %c0_10 = arith.constant 0 : index
      %12 = vector.load %arg2[%c0_9, %c0_10] : memref<8x96xf32, #tpu.memory_space<vmem>>, vector<8x96xf32>
      %cst_11 = arith.constant dense<0.000000e+00> : vector<8xf32>
      %13 = vector.multi_reduction <add>, %12, %cst_11 [1] : vector<8x96xf32> to vector<8xf32>
      %14 = vector.shape_cast %13 : vector<8xf32> to vector<8x1xf32>
      %15 = arith.mulf %12, %12 : vector<8x96xf32>
      %cst_12 = arith.constant dense<0.000000e+00> : vector<8xf32>
      %16 = vector.multi_reduction <add>, %15, %cst_12 [1] : vector<8x96xf32> to vector<8xf32>
      %17 = vector.shape_cast %16 : vector<8xf32> to vector<8x1xf32>
      %cst_13 = arith.constant 0.010416667 : f32
      %18 = vector.broadcast %cst_13 : f32 to vector<8x1xf32>
      %19 = arith.mulf %14, %18 : vector<8x1xf32>
      %cst_14 = arith.constant 0.010416667 : f32
      %20 = vector.broadcast %cst_14 : f32 to vector<8x1xf32>
      %21 = arith.mulf %17, %20 : vector<8x1xf32>
      %22 = arith.mulf %19, %19 : vector<8x1xf32>
      %23 = arith.subf %21, %22 : vector<8x1xf32>
      %cst_15 = arith.constant 0.000000e+00 : f32
      %24 = vector.broadcast %cst_15 : f32 to vector<8x1xf32>
      %25 = arith.maximumf %23, %24 : vector<8x1xf32>
      %cst_16 = arith.constant 9.99999974E-6 : f32
      %26 = vector.broadcast %cst_16 : f32 to vector<8x1xf32>
      %27 = arith.addf %25, %26 : vector<8x1xf32>
      %28 = math.rsqrt %27 : vector<8x1xf32>
      %29 = vector.broadcast %19 : vector<8x1xf32> to vector<8x96xf32>
      %30 = arith.subf %12, %29 : vector<8x96xf32>
      %31 = vector.broadcast %28 : vector<8x1xf32> to vector<8x96xf32>
      %32 = arith.mulf %30, %31 : vector<8x96xf32>
      %c0_17 = arith.constant 0 : index
      %c0_18 = arith.constant 0 : index
      %33 = vector.load %arg3[%c0_17, %c0_18] : memref<1x96xf32, #tpu.memory_space<vmem>>, vector<1x96xf32>
      %34 = vector.broadcast %33 : vector<1x96xf32> to vector<8x96xf32>
      %35 = arith.mulf %32, %34 : vector<8x96xf32>
      %c0_19 = arith.constant 0 : index
      %c0_20 = arith.constant 0 : index
      %36 = vector.load %arg4[%c0_19, %c0_20] : memref<1x96xf32, #tpu.memory_space<vmem>>, vector<1x96xf32>
      %37 = vector.broadcast %36 : vector<1x96xf32> to vector<8x96xf32>
      %38 = arith.addf %35, %37 : vector<8x96xf32>
      %39 = arith.truncf %38 : vector<8x96xf32> to vector<8x96xbf16>
      %c0_21 = arith.constant 0 : index
      %c0_22 = arith.constant 0 : index
      %40 = vector.load %arg8[%c0_21, %c0_22] : memref<8x96xbf16, #tpu.memory_space<vmem>>, vector<8x96xbf16>
      tpu.vector_store %arg8[%c0_21, %c0_22], %39 {strides = array<i32>} : memref<8x96xbf16, #tpu.memory_space<vmem>>, vector<8x96xbf16>,
    } else {
    }
    %c0 = arith.constant 0 : index
    %c0_1 = arith.constant 0 : index
    %3 = vector.load %arg8[%c0, %c0_1] : memref<8x96xbf16, #tpu.memory_space<vmem>>, vector<8x96xbf16>
    %c0_2 = arith.constant 0 : index
    %c0_3 = arith.constant 0 : index
    %4 = vector.load %arg5[%c0_2, %c0_3] : memref<96x128xbf16, #tpu.memory_space<vmem>>, vector<96x128xbf16>
    %cst = arith.constant dense<0.000000e+00> : vector<8x128xf32>
    %5 = tpu.matmul %3, %4, %cst {dimension_numbers = #tpu.dot_dimension_numbers<[1], [0], [0], [1], [0, 0, 1, 1], [], []>} : vector<8x96xbf16>, vector<96x128xbf16>, vector<8x128xf32> -> vector<8x128xf32>
    %c0_4 = arith.constant 0 : index
    %c0_5 = arith.constant 0 : index
    %6 = vector.load %arg6[%c0_4, %c0_5] : memref<1x128xf32, #tpu.memory_space<vmem>>, vector<1x128xf32>
    %7 = vector.broadcast %6 : vector<1x128xf32> to vector<8x128xf32>
    %8 = arith.addf %5, %7 : vector<8x128xf32>
    %cst_6 = arith.constant 0.000000e+00 : f32
    %9 = vector.broadcast %cst_6 : f32 to vector<8x128xf32>
    %10 = arith.maximumf %8, %9 : vector<8x128xf32>
    %c0_7 = arith.constant 0 : index
    %c0_8 = arith.constant 0 : index
    %11 = vector.load %arg7[%c0_7, %c0_8] : memref<8x128xf32, #tpu.memory_space<vmem>>, vector<8x128xf32>
    tpu.vector_store %arg7[%c0_7, %c0_8], %10 {strides = array<i32>} : memref<8x128xf32, #tpu.memory_space<vmem>>, vector<8x128xf32>,
    return
  }
  func.func @transform_0(%arg0: i32, %arg1: i32) -> (i32, i32) {
    %c0_i32 = arith.constant 0 : i32
    %c0_i32_0 = arith.constant 0 : i32
    return %arg0, %c0_i32 : i32, i32
  }
  func.func @transform_1(%arg0: i32, %arg1: i32) -> (i32, i32) {
    %c0_i32 = arith.constant 0 : i32
    %c0_i32_0 = arith.constant 0 : i32
    %c0_i32_1 = arith.constant 0 : i32
    return %c0_i32, %c0_i32_0 : i32, i32
  }
  func.func @transform_2(%arg0: i32, %arg1: i32) -> (i32, i32) {
    %c0_i32 = arith.constant 0 : i32
    %c0_i32_0 = arith.constant 0 : i32
    %c0_i32_1 = arith.constant 0 : i32
    return %c0_i32, %c0_i32_0 : i32, i32
  }
  func.func @transform_3(%arg0: i32, %arg1: i32) -> (i32, i32) {
    %c0_i32 = arith.constant 0 : i32
    %c0_i32_0 = arith.constant 0 : i32
    return %c0_i32, %arg1 : i32, i32
  }
  func.func @transform_4(%arg0: i32, %arg1: i32) -> (i32, i32) {
    %c0_i32 = arith.constant 0 : i32
    %c0_i32_0 = arith.constant 0 : i32
    return %c0_i32, %arg1 : i32, i32
  }
  func.func @transform_5(%arg0: i32, %arg1: i32) -> (i32, i32) {
    %c0_i32 = arith.constant 0 : i32
    return %arg0, %arg1 : i32, i32
  }
}

</mosaic_0001>

<bundles_post_ra>
// kernel: tpu_custom_call.1
= control target key start
LH: loop header
LB: loop body
LE: loop exit
PB: predicated region body
PF: predicated region fallthrough
CT: control target
= control target key end

     0   :  { %10 = vsyncpa [#allocation4], 0  ;;  %s400_s0 = inlined_call_operand.hbm [shape: f32[8,96], index: 0, kind: input, shape index: {}]   ;;  %s401_s1 = inlined_call_operand.hbm [shape: f32[1,96], index: 1, kind: input, shape index: {}]   ;;  %s402_s2 = inlined_call_operand.vmem [shape: f32[1,96], index: 2, kind: input, shape index: {}]   ;;  %s403_s3 = inlined_call_operand.hbm [shape: bf16[96,128], index: 3, kind: input, shape index: {}]   ;;  %s404_s4 = inlined_call_operand.vmem [shape: f32[1,128], index: 4, kind: input, shape index: {}]   ;;  %s405_s5 = inlined_call_operand.hbm [shape: f32[8,128], index: 5, kind: output, shape index: {}]  }
   0x1   :  { %11 = vsyncpa [#allocation7], 0  ;;  %s29_s20 = sshll.u32 %s401_s1, 4  ;;  %s30_s20 = int_to_ptr.hbm [resolvable:$true] %s29_s20 }
   0x2   :  { %12 = vsyncpa [#allocation5], 0  ;;  %s343_s21 = smov [#allocation6]   ;;  %s18_s25 = sshll.u32 %s400_s0, 4  ;;  %s19_s25 = int_to_ptr.hbm [resolvable:$true] %s18_s25 }
   0x3   :  { %s31_s22 = sshll.u32 %s343_s21, 4  ;;  %s344_s26 = smov [#allocation3]   ;;  %s32_s22 = int_to_ptr.vmem [resolvable:$true] %s31_s22 }
   0x4   :  { %34 = dma.hbm_to_vmem [thread:$0]  %s30_s20, 16, %s32_s22, [#allocation7]  }
   0x5   :  { %s20_s27 = sshll.u32 %s344_s26, 4  ;;  %s41_s30 = sshll.u32 %s403_s3, 4  ;;  %s21_s27 = int_to_ptr.vmem [resolvable:$true] %s20_s27  ;;  %s42_s30 = int_to_ptr.hbm [resolvable:$true] %s41_s30 }
   0x6   :  { %23 = dma.hbm_to_vmem [thread:$0]  %s19_s25, 128, %s21_s27, [#allocation4]  }
   0x7   :  { %s345_s1 = smov [#allocation8]   ;;  %s346_s7 = smov 64  }
   0x8   :  { %s43_s6 = sshll.u32 %s345_s1, 4  ;;  %s347_s8 = smov 4   ;;  %s44_s6 = int_to_ptr.vmem [resolvable:$true] %s43_s6 }
   0x9   :  { %49 = dma.hbm_to_vmem [thread:$0]  %s42_s30, 768, %s44_s6, [#allocation7], %s346_s7, %s346_s7, %s347_s8  }
   0xa   :  { %337 = dma.done.wait [#allocation4], 128  }
   0xb   :  { %338 = vsyncadd [#allocation4], 4294967168 }
   0xc   :  { %339 = dma.done.wait [#allocation7], 784  }
   0xd   :  { %340 = vsyncadd [#allocation7], 4294966512  ;;  %vm70_vm0 = vcmask 785408   ;;  %v69_v0 = vld [vmem:[#allocation3] sm:$0xff]  ;;  %v229_v4 = vld [vmem:[#allocation8 + $0x28] sm:$0xff]  ;;  %vm107_vm4 = vcmask 781312  }
   0xe   :  { %v71_v1 = vsel %vm70_vm0, %v69_v0, 0.0  ;;  %v74_v2 = vmul.f32 %v69_v0, %v69_v0  ;;  %168 = vmatpush.bf16.msra.mxu0 %v229_v4  ;;  %v228_v5 = vld [vmem:[#allocation8 + $0x20] sm:$0xff]  ;;  %v227_v7 = vld [vmem:[#allocation8 + $0x18] sm:$0xff]  ;;  %v226_v9 = vld [vmem:[#allocation8 + $0x10] sm:$0xff]  ;;  %s348_s11 = smov [#allocation9]  }
   0xf   :  { %72 = vadd.xlane.f32.xlu0 %v71_v1  ;;  %v225_v13 = vld [vmem:[#allocation8 + $0x8] sm:$0xff]  ;;  %v224_v15 = vld [vmem:[#allocation8] sm:$0xff]  ;;  %v236_v25 = vld [vmem:[#allocation6] ss:$0 sm:$0xff]  ;;  %s186_s12 = sshll.u32 %s348_s11, 4  ;;  %s187_s12 = int_to_ptr.vmem [resolvable:$true] %s186_s12 }
  0x10   :  { %v75_v3 = vsel %vm70_vm0, %v74_v2, 0.0  ;;  %v237_v27 = vld [vmem:[%s402_s2] ss:$0 sm:$0xff]  ;;  %s188_s2 = sshll.u32 %s405_s5, 4  ;;  %s189_s2 = int_to_ptr.hbm [resolvable:$true] %s188_s2 }
  0x11   :  { %v238_v33 = vld [vmem:[%s404_s4] ss:$0 sm:$0xff] }
  0x12   :  { %169 = vmatpush.bf16.msra.mxu0 %v228_v5 }
  0x16   :  { %170 = vmatpush.bf16.msra.mxu0 %v227_v7 }
  0x17   :  { %76 = vadd.xlane.f32.xlu0 %v75_v3 }
  0x1a   :  { %171 = vmatpush.bf16.msra.mxu0 %v226_v9 }
  0x1e   :  { %172 = vmatpush.bf16.msra.mxu0 %v225_v13 }
  0x22   :  { %173 = vmatpush.bf16.msra.mxu0 %v224_v15 }
  0x82   :  { %v73_v6 = vpop.xlane.xlu0 %72 }
  0x83   :  { %v78_v8 = vmul.f32 0.010416667, %v73_v6 }
  0x85   :  { %v80_v11 = vmul.f32 %v78_v8, %v78_v8  ;;  %v94_v24 = vsub.f32 %v69_v0, %v78_v8 }
  0x8a   :  { %v77_v10 = vpop.xlane.xlu0 %76 }
  0x8b   :  { %v79_v12 = vmul.f32 0.010416667, %v77_v10 }
  0x8d   :  { %v81_v14 = vsub.f32 %v79_v12, %v80_v11 }
  0x8f   :  { %v82_v16 = vmax.f32 %v81_v14, 0.0 }
  0x91   :  { %v83_v17 = vadd.f32 1e-05, %v82_v16 }
  0x93   :  { %239 = vrsqrt.f32 %v83_v17  ;;  %vm90_vm2 = vweird.f32 %v83_v17 }
  0x99   :  { %v240_v18 = vpop.eup %239 }
  0x9a   :  { %v85_v19 = vmul.f32 %v240_v18, %v83_v17  ;;  %vm91_vm1 = vweird.f32 %v240_v18 }
  0x9b   :  { %vm92_vm3 = vmor %vm90_vm2, %vm91_vm1 }
  0x9c   :  { %v86_v20 = vmul.f32 %v240_v18, %v85_v19 }
  0x9e   :  { %v87_v21 = vmul.f32 0.5, %v86_v20 }
  0xa0   :  { %v88_v22 = vsub.f32 1.5, %v87_v21 }
  0xa2   :  { %v89_v23 = vmul.f32 %v240_v18, %v88_v22 }
  0xa4   :  { %v93_v26 = vsel %vm92_vm3, %v240_v18, %v89_v23 }
  0xa5   :  { %v95_v28 = vmul.f32 %v94_v24, %v93_v26 }
  0xa7   :  { %v100_v29 = vmul.f32 %v236_v25, %v95_v28 }
  0xa9   :  { %v105_v30 = vadd.f32 %v237_v27, %v100_v29 }
  0xab   :  { %v106_v31 = vpack.c.bf16 %v105_v30, %v105_v30 }
  0xad   :  { %108 = vst.msk [vmem:[#allocation2] sm:$0xf] %vm107_vm4, %v106_v31 }
  0xb4   :  { %v109_v32 = vld [vmem:[#allocation2] sm:$0xf] }
  0xb5   :  { %223 = vmatmul.msk.bf16.vlgmr.msra.gmra.mxu0 %vm70_vm0, %v109_v32 }
 0x132   :  { %v175_v34 = vpop.f32.mrf.mxu0 }
 0x133   :  { %v176_v35 = vadd.f32 %v238_v33, %v175_v34 }
 0x135   :  { %v179_v36 = vmax.f32 %v176_v35, 0.0 }
 0x137   :  { %180 = vst [vmem:[#allocation9] sm:$0xff] %v179_v36 }
 0x138   :  { %191 = dma.vmem_to_hbm [thread:$0]  %s187_s12, 128, %s189_s2, [#allocation5]  }
 0x13a   :  { %v177_v37 = vpop.f32.mrf.mxu0 }
 0x13b   :  { %341 = dma.done.wait [#allocation5], 128  }
 0x13c   :  { %342 = vsyncadd [#allocation5], 4294967168 }
 0x13d   :  { %196 = vsyncpa [#allocation4], 1 }
 0x13e   :  { %197 = vsyncpa [#allocation7], 1 }
 0x13f   :  { %198 = vsyncpa [#allocation5], 1 }

</bundles_post_ra>
